<compile_context>
chip_gen: v5e
topology: v5e:2x2
jax: 0.10.0
libtpu: 0.0.40
codegen_flags: <defaults>
</compile_context>

<pallas_src>
import jax
import jax.numpy as jnp
from jax.experimental import pallas as pl
from jax.experimental.pallas import tpu as pltpu


def _pa_kernel(x_ref, w1t_ref, b1_ref, w2_ref, b2_ref, o_ref):
    # x_ref:  (1, C, TP) tile; channels on sublanes, pixels on lanes.
    # w1t_ref: (CR, C), b1_ref: (CR, 1), w2_ref: (CR, 1), b2_ref: (1, 1) SMEM.
    x = x_ref[0]                                                    # (C, TP)

    # conv1 (1x1): C -> CR, + bias, ReLU  (MXU matmul, K = C)
    h = jnp.dot(w1t_ref[...], x, preferred_element_type=jnp.float32)  # (CR, TP)
    h = jnp.maximum(h + b1_ref[...], 0.0)

    # conv2 (1x1): CR -> 1, + bias, Sigmoid.  M=1 matmul replaced with a VPU
    # multiply + tiny sublane reduce (MXU stays idle, kernel is mem-bound).
    y = jnp.sum(h * w2_ref[...], axis=0, keepdims=True) + b2_ref[0, 0]  # (1, TP)
    y = jax.nn.sigmoid(y)

    # pixel attention: broadcast-multiply over channels (sublane broadcast).
    o_ref[0] = (x * y).astype(o_ref.dtype)


def _pick_tile_hw(HW, C, B, itemsize):
    """Largest pixel tile that fits the double-buffered in+out VMEM budget."""
    budget = 12 << 20                              # bytes: 2*(in+out) buffers
    cap = max(128, budget // (4 * C * itemsize))
    cap = min(cap, 2048)

    # prefer the largest multiple of 128 that divides HW (no tail block)
    best, t = 0, 128
    while t <= min(cap, HW):
        if HW % t == 0:
            best = t
        t += 128
    if best == 0:
        # no clean 128-multiple divisor: take all of HW if it fits, otherwise
        # tile by a 128-multiple and let Pallas mask the tail block.
        best = HW if HW <= cap else (cap // 128) * 128

    # keep >= 4 parallel grid steps when possible (v7x has 2 TensorCores)
    while (best % 256 == 0) and (HW % (best // 2) == 0) and (
        B * pl.cdiv(HW, best) < 4
    ):
        best //= 2
    return best


def pa_layer(x_nchw, w1, b1, w2, b2):
    """x_nchw: (B, C, H, W). w1: (C, CR), b1: (1, CR), w2: (CR, 1), b2: (1, 1)."""
    B, C, H, W = x_nchw.shape
    CR = w1.shape[1]
    HW = H * W
    itemsize = jnp.dtype(x_nchw.dtype).itemsize

    # Free reshape: NCHW -> (B, C, HW).  No transposes, no extra HBM traffic.
    x = x_nchw.reshape(B, C, HW)
    w1t = jnp.transpose(w1)                        # (CR, C)  tiny
    b1c = jnp.reshape(b1, (CR, 1))                 # column bias
    w2c = jnp.reshape(w2, (CR, 1))
    b2s = jnp.reshape(b2, (1, 1)).astype(jnp.float32)

    tile = _pick_tile_hw(HW, C, B, itemsize)
    n_tiles = pl.cdiv(HW, tile)

    cost = pl.CostEstimate(
        flops=2 * B * HW * C * CR + 4 * B * HW * CR + 2 * B * HW * C,
        transcendentals=B * HW,                    # sigmoid
        bytes_accessed=2 * B * HW * C * itemsize + (C * CR + 2 * CR + 1) * 4,
    )

    out = pl.pallas_call(
        _pa_kernel,
        out_shape=jax.ShapeDtypeStruct((B, C, HW), x.dtype),
        grid_spec=pltpu.PrefetchScalarGridSpec(
            num_scalar_prefetch=0,
            grid=(B, n_tiles),
            in_specs=[
                pl.BlockSpec((1, C, tile), lambda b, p: (b, 0, p)),
                pl.BlockSpec((CR, C), lambda b, p: (0, 0)),
                pl.BlockSpec((CR, 1), lambda b, p: (0, 0)),
                pl.BlockSpec((CR, 1), lambda b, p: (0, 0)),
                pl.BlockSpec(memory_space=pltpu.MemorySpace.SMEM),
            ],
            out_specs=pl.BlockSpec((1, C, tile), lambda b, p: (b, 0, p)),
        ),
        compiler_params=pltpu.CompilerParams(
            dimension_semantics=("parallel", "parallel"),
            vmem_limit_bytes=32 << 20,
        ),
        cost_estimate=cost,
    )(x, w1t, b1c, w2c, b2s)

    # Free reshape back to NCHW.
    return out.reshape(B, C, H, W)


def pa_layer_ref(x_nchw, w1, b1, w2, b2):
    """Pure-JAX reference matching PyTorch PALayer forward."""
    x = jnp.transpose(x_nchw, (0, 2, 3, 1))                       # (B, H, W, C)
    h = jnp.maximum(x @ w1 + b1.reshape(-1), 0.0)                 # (B, H, W, CR)
    y = jax.nn.sigmoid(h @ w2 + b2.reshape(-1))                   # (B, H, W, 1)
    return jnp.transpose(x * y, (0, 3, 1, 2))


if __name__ == "__main__":
    # channel must be >= 8 so channel // 8 >= 1 (as the PyTorch module requires)
    B, C, H, W = 2, 32, 16, 16
    CR = C // 8

    key = jax.random.PRNGKey(0)
    kx, kw1, kb1, kw2, kb2 = jax.random.split(key, 5)

    x = jax.random.normal(kx, (B, C, H, W), dtype=jnp.float32)
    # Conv2d(channel, channel//8, 1) weight (CR, C, 1, 1) stored here as (C, CR)
    w1 = jax.random.normal(kw1, (C, CR), dtype=jnp.float32) * 0.1
    b1 = jax.random.normal(kb1, (1, CR), dtype=jnp.float32) * 0.1
    # Conv2d(channel//8, 1, 1) weight (1, CR, 1, 1) stored here as (CR, 1)
    w2 = jax.random.normal(kw2, (CR, 1), dtype=jnp.float32) * 0.1
    b2 = jax.random.normal(kb2, (1, 1), dtype=jnp.float32) * 0.1

    out = pa_layer(x, w1, b1, w2, b2)
    jax.block_until_ready(out)

    ref = pa_layer_ref(x, w1, b1, w2, b2)
    assert out.shape == (B, C, H, W)
    assert jnp.allclose(out, ref, atol=1e-5, rtol=1e-5), "mismatch vs reference"

    print("KERNEL_OK")
</pallas_src>

<mosaic_0001>
module attributes {stable_mosaic.version = 11 : i64} {
  func.func @_pa_kernel(%arg0: i32, %arg1: i32, %arg2: memref<1x32x128xf32, #tpu.memory_space<vmem>>, %arg3: memref<4x32xf32, #tpu.memory_space<vmem>>, %arg4: memref<4x1xf32, #tpu.memory_space<vmem>>, %arg5: memref<4x1xf32, #tpu.memory_space<vmem>>, %arg6: memref<1x1xf32, #tpu.memory_space<smem>>, %arg7: memref<1x32x128xf32, #tpu.memory_space<vmem>>) attributes {dimension_semantics = [#tpu.dimension_semantics<parallel>, #tpu.dimension_semantics<parallel>], iteration_bounds = array<i64: 2, 2>, scalar_prefetch = 0 : i64, scratch_operands = 0 : i64, tpu.core_type = #tpu.core_type<tc>, window_params = [{transform_indices = @transform_0, window_bounds = array<i64: 1, 32, 128>}, {pipeline_mode = #tpu.pipeline_mode<synchronous>, transform_indices = @transform_1, window_bounds = array<i64: 4, 32>}, {pipeline_mode = #tpu.pipeline_mode<synchronous>, transform_indices = @transform_2, window_bounds = array<i64: 4, 1>}, {pipeline_mode = #tpu.pipeline_mode<synchronous>, transform_indices = @transform_3, window_bounds = array<i64: 4, 1>}, {transform_indices = @transform_4, window_bounds = array<i64: 1, 1>}, {transform_indices = @transform_5, window_bounds = array<i64: 1, 32, 128>}]} {
    %c0 = arith.constant 0 : index
    %c0_0 = arith.constant 0 : index
    %c0_1 = arith.constant 0 : index
    %0 = vector.load %arg2[%c0, %c0_0, %c0_1] : memref<1x32x128xf32, #tpu.memory_space<vmem>>, vector<1x32x128xf32>
    %1 = vector.shape_cast %0 : vector<1x32x128xf32> to vector<32x128xf32>
    %c0_2 = arith.constant 0 : index
    %c0_3 = arith.constant 0 : index
    %2 = vector.load %arg3[%c0_2, %c0_3] : memref<4x32xf32, #tpu.memory_space<vmem>>, vector<4x32xf32>
    %cst = arith.constant dense<0.000000e+00> : vector<4x128xf32>
    %3 = tpu.matmul %2, %1, %cst {dimension_numbers = #tpu.dot_dimension_numbers<[1], [0], [0], [1], [0, 0, 1, 1], [], []>} : vector<4x32xf32>, vector<32x128xf32>, vector<4x128xf32> -> vector<4x128xf32>
    %c0_4 = arith.constant 0 : index
    %c0_5 = arith.constant 0 : index
    %4 = vector.load %arg4[%c0_4, %c0_5] : memref<4x1xf32, #tpu.memory_space<vmem>>, vector<4x1xf32>
    %5 = vector.broadcast %4 : vector<4x1xf32> to vector<4x128xf32>
    %6 = arith.addf %3, %5 : vector<4x128xf32>
    %cst_6 = arith.constant 0.000000e+00 : f32
    %7 = vector.broadcast %cst_6 : f32 to vector<4x128xf32>
    %8 = arith.maximumf %6, %7 : vector<4x128xf32>
    %c0_7 = arith.constant 0 : index
    %c0_8 = arith.constant 0 : index
    %9 = vector.load %arg5[%c0_7, %c0_8] : memref<4x1xf32, #tpu.memory_space<vmem>>, vector<4x1xf32>
    %10 = vector.broadcast %9 : vector<4x1xf32> to vector<4x128xf32>
    %11 = arith.mulf %8, %10 : vector<4x128xf32>
    %cst_9 = arith.constant dense<0.000000e+00> : vector<128xf32>
    %12 = vector.multi_reduction <add>, %11, %cst_9 [0] : vector<4x128xf32> to vector<128xf32>
    %13 = vector.shape_cast %12 : vector<128xf32> to vector<1x128xf32>
    %c0_10 = arith.constant 0 : index
    %c0_11 = arith.constant 0 : index
    %14 = memref.load %arg6[%c0_10, %c0_11] : memref<1x1xf32, #tpu.memory_space<smem>>
    %15 = vector.broadcast %14 : f32 to vector<1x128xf32>
    %16 = arith.addf %13, %15 : vector<1x128xf32>
    %17 = arith.negf %16 : vector<1x128xf32>
    %18 = math.exp %17 : vector<1x128xf32>
    %cst_12 = arith.constant 1.000000e+00 : f32
    %19 = vector.broadcast %cst_12 : f32 to vector<1x128xf32>
    %20 = arith.addf %19, %18 : vector<1x128xf32>
    %21 = arith.divf %19, %20 : vector<1x128xf32>
    %22 = vector.broadcast %21 : vector<1x128xf32> to vector<32x128xf32>
    %23 = arith.mulf %1, %22 : vector<32x128xf32>
    %c0_13 = arith.constant 0 : index
    %c0_14 = arith.constant 0 : index
    %c0_15 = arith.constant 0 : index
    %24 = vector.load %arg7[%c0_13, %c0_14, %c0_15] : memref<1x32x128xf32, #tpu.memory_space<vmem>>, vector<1x32x128xf32>
    %25 = vector.shape_cast %24 : vector<1x32x128xf32> to vector<32x128xf32>
    %26 = vector.shape_cast %23 : vector<32x128xf32> to vector<1x32x128xf32>
    tpu.vector_store %arg7[%c0_13, %c0_14, %c0_15], %26 {strides = array<i32>} : memref<1x32x128xf32, #tpu.memory_space<vmem>>, vector<1x32x128xf32>,
    return
  }
  func.func @transform_0(%arg0: i32, %arg1: i32) -> (i32, i32, i32) {
    %c0_i32 = arith.constant 0 : i32
    %c0_i32_0 = arith.constant 0 : i32
    return %arg0, %c0_i32, %arg1 : i32, i32, i32
  }
  func.func @transform_1(%arg0: i32, %arg1: i32) -> (i32, i32) {
    %c0_i32 = arith.constant 0 : i32
    %c0_i32_0 = arith.constant 0 : i32
    %c0_i32_1 = arith.constant 0 : i32
    return %c0_i32, %c0_i32_0 : i32, i32
  }
  func.func @transform_2(%arg0: i32, %arg1: i32) -> (i32, i32) {
    %c0_i32 = arith.constant 0 : i32
    %c0_i32_0 = arith.constant 0 : i32
    %c0_i32_1 = arith.constant 0 : i32
    return %c0_i32, %c0_i32_0 : i32, i32
  }
  func.func @transform_3(%arg0: i32, %arg1: i32) -> (i32, i32) {
    %c0_i32 = arith.constant 0 : i32
    %c0_i32_0 = arith.constant 0 : i32
    %c0_i32_1 = arith.constant 0 : i32
    return %c0_i32, %c0_i32_0 : i32, i32
  }
  func.func @transform_4(%arg0: i32, %arg1: i32) -> (i32, i32) {
    %c0_i32 = arith.constant 0 : i32
    %c0_i32_0 = arith.constant 0 : i32
    %c0_i32_1 = arith.constant 0 : i32
    return %c0_i32, %c0_i32_0 : i32, i32
  }
  func.func @transform_5(%arg0: i32, %arg1: i32) -> (i32, i32, i32) {
    %c0_i32 = arith.constant 0 : i32
    %c0_i32_0 = arith.constant 0 : i32
    return %arg0, %c0_i32, %arg1 : i32, i32, i32
  }
}

</mosaic_0001>

<bundles_post_ra>
// kernel: tpu_custom_call.1
= control target key start
LH: loop header
LB: loop body
LE: loop exit
PB: predicated region body
PF: predicated region fallthrough
CT: control target
= control target key end

     0   :  { %s881_s0 = inlined_call_operand.hbm [shape: f32[2,32,256], index: 0, kind: input, shape index: {}]   ;;  %s882_s1 = inlined_call_operand.vmem [shape: f32[4,32], index: 1, kind: input, shape index: {}]   ;;  %s883_s2 = inlined_call_operand.vmem [shape: f32[4,1], index: 2, kind: input, shape index: {}]   ;;  %s884_s3 = inlined_call_operand.vmem [shape: f32[4,1], index: 3, kind: input, shape index: {}]   ;;  %s885_s4 = inlined_call_operand.<no memory space> [shape: f32[1,1], index: 4, kind: input, shape index: {}]   ;;  %s886_s5 = inlined_call_operand.hbm [shape: f32[2,32,256], index: 5, kind: output, shape index: {}]  }
   0x1   :  { %10 = sst [smem:[#allocation2]] %s885_s4 }
   0x2   :  { %11 = vsyncpa [#allocation4], 0 }
   0x3   :  { %13 = vsyncpa [#allocation4 + $0x1], 0 }
   0x4   :  { %14 = vsyncpa [#allocation5], 0 }
   0x5   :  { %16 = vsyncpa [#allocation5 + $0x1], 0  ;;  %s726_s20 = smov 0   ;;  %s728_s21 = smov 0  }
   0x6   :  { %s730_s22 = smov 0   ;;  %s732_s23 = smov 0  }
   0x7   :  { %s734_s24 = smov 0   ;;  %s736_s25 = smov 0  }
   0x8   :  { %s738_s26 = smov 0   ;;  %s740_s27 = smov 0  }
   0x9 LB: > { %890 = sst [smem:[#allocation9_spill]] %s664_s22  ;;  %s449_s4 = sadd.s32 4294967295, %s684_s27   ;;  %s684_s27 = sphi %s740_s27, %s22_s27   ;;  %s680_s26 = sphi %s738_s26, %s907_s26   ;;  %s676_s25 = sphi %s736_s25, %s906_s25   ;;  %s672_s24 = sphi %s734_s24, %s905_s24   ;;  %s668_s23 = sphi %s732_s23, %s904_s23   ;;  %s664_s22 = sphi %s730_s22, %s899_s22   ;;  %s660_s21 = sphi %s728_s21, %s903_s21   ;;  %s656_s20 = sphi %s726_s20, %s902_s20  }
   0xa   : > { %s450_s28 = sadd.s32 4294967294, %s684_s27   ;;  %s31_s29 = sadd.s32 1, %s676_s25 }
   0xb   : > { %s34_s30 = sadd.s32 1, %s680_s26  ;;  %p32_p0 = scmp.ge.s32.totalorder %s31_s29, 2 }
   0xc   : > { %s43_s6 = sadd.s32 1, %s664_s22  ;;  %p50_p1 = scmp.ne.s32.totalorder %s664_s22, %s660_s21 }
   0xd   : > { %p51_p2 = scmp.eq.s32.totalorder %s684_s27, 0  ;;  %s909_s29 = smov (%p32_p0, %s31_s29), 0 }
   0xe   : > { %891 = sst [smem:[#allocation10_spill]] %s909_s29  ;;  %s911_s30 = smov (!%p32_p0, %s34_s30), %s680_s26 }
   0xf   : > { %s39_s7 = ssub.s32 %s676_s25, %s909_s29  ;;  %p779_p3 = por %p51_p2, %p50_p1 }
  0x10   : > { %p36_p4 = scmp.ge.s32.totalorder %s911_s30, 2  ;;  %p56_p5 = scmp.ne.s32.totalorder %s660_s21, %s656_s20 }
  0x11   : > { %p57_p6 = scmp.eq.s32.totalorder %s449_s4, 0  ;;  %p166_p7 = scmp.eq.s32.totalorder %s449_s4, 3 }
  0x12   : > { %s913_s30 = smov (%p36_p4, %s911_s30), 0  ;;  %p172_p10 = scmp.eq.s32.totalorder %s450_s28, 3 }
  0x13   : > { %893 = sst [smem:[#allocation11_spill]] %s913_s30  ;;  %p787_p8 = por %p57_p6, %p56_p5 }
  0x14   : > { %p791_p9 = por %p166_p7, %p50_p1  ;;  %s38_s11 = ssub.s32 %s680_s26, %s913_s30 }
  0x15   : > { %s40_s12 = sor.u32 %s39_s7, %s38_s11  ;;  %p797_p12 = por %p172_p10, %p56_p5 }
  0x16   : > { %p41_p11 = scmp.eq.s32.totalorder %s40_s12, 0  ;;  %p478_p13 = scmp.lt.s32.totalorder %s684_s27, 4 }
  0x17   : > { %s204_s14 = sand.u32 1, %s664_s22   ;;  %s454_s17 = sshll.u32 %s680_s26, 3 }
  0x18   : > { %s804_s15 = scalar_select %p41_p11, %s664_s22, %s43_s6  }
  0x19   : > { %s453_s16 = sshll.u32 %s204_s14, 5  ;;  %s212_s18 = sadd.s32 %s676_s25, %s454_s17 }
  0x1a   : > { %897 = sst [smem:[#allocation12_spill]] %s804_s15  ;;  %s208_s19 = scalar_lea.vmem [#allocation3], %s453_s16 }
  0x1b   : > { %s217_s4 = sshll.u32 %s208_s19, 4  ;;  %s455_s30 = sshll.u32 %s212_s18, 3  ;;  %s218_s4 = int_to_ptr.vmem [resolvable:$true] %s217_s4 }
  0x1c   : > { %s214_s11 = scalar_lea.hbm %s881_s0, %s455_s30  ;;  %p471_p0 = pnand %p478_p13, %p779_p3 }
  0x1d   : > { %s215_s12 = sshll.u32 %s214_s11, 4  ;;  %s205_s29 = scalar_lea.sflag [#allocation4], %s204_s14  ;;  %s216_s12 = int_to_ptr.hbm [resolvable:$true] %s215_s12 }
  0x1e   : > { %s686_s6 = smov 256   ;;  %s687_s15 = smov 128  }
  0x1f   : > { %s688_s22 = smov 8   ;;  %p456_p1 = scmp.ge.s32.totalorder %s684_s27, 1 }
  0x20   : > { %473 = dma.hbm_to_vmem [thread:$0]  (!%p471_p0), %s216_s12, 512, %s218_s4, %s205_s29, %s686_s6, %s687_s15, %s688_s22  }
  0x21   : > { %p225_p2 = scmp.lt.s32.totalorder %s684_s27, 5 }
  0x23   : > { %p226_p4 = pnand %p456_p1, %p225_p2 }
  0x24   : > { %s816_s16 = sand.u32 (!%p226_p4), 1, %s660_s21  }
  0x25   : > { %229 = sbr.rel (%p226_p4) target bundleno = 236 (0xec), region = 40  ;;  %s457_s30 = sshll.u32 (!%p226_p4), %s816_s16, 5 }
  0x26   : > { %s232_s8 = scalar_lea.sflag (!%p226_p4), [#allocation4], %s816_s16  ;;  %s235_s17 = scalar_lea.vmem (!%p226_p4), [#allocation3], %s457_s30 }
  0x2a   : > { %647 = dma.done.wait (%p787_p8), %s232_s8, 512  }
  0x2b   : > { %649 = vsyncadd (%p787_p8), %s232_s8, 4294966784  ;;  %v689_v0 = vmov 0   ;;  %v266_v1 = vld [vmem:[%s235_s17 + $0x18] sm:$0xff]  ;;  %v265_v2 = vld [vmem:[%s235_s17 + $0x10] sm:$0xff]  ;;  %vm274_vm0 = vcmask 261120   ;;  %vm306_vm1 = vcmask 1043456  }
  0x2c   : > { %551 = vset.pattern.permute.xlu0 %v689_v0  ;;  %290 = vmatpush.msra.mxu0 %v266_v1  ;;  %v268_v3 = vld [vmem:[%s883_s2] sm:$0xf]  ;;  %v264_v4 = vld [vmem:[%s235_s17 + $0x8] sm:$0xff]  ;;  %s314_s19 = sld [smem:[#allocation2]]  ;;  %s462_s4 = sshll.u32 %s672_s24, 3 }
  0x2d   : > { %271 = vperm.xlu0 %551, %v268_v3   ;;  %v263_v5 = vld [vmem:[%s235_s17] sm:$0xff]  ;;  %s355_s28 = sadd.s32 %s668_s23, %s462_s4  ;;  %s262_s24 = scalar_lea.vmem [#allocation6], %s457_s30 }
  0x2e   : > { %291 = vmatpush.msra.mxu0 %v265_v2  ;;  %v267_v6 = vld [vmem:[%s882_s1] sm:$0xf]  ;;  %s463_s7 = sshll.u32 %s355_s28, 3  ;;  %s358_s23 = sshll.u32 %s262_s24, 4  ;;  %s359_s23 = int_to_ptr.vmem [resolvable:$true] %s358_s23 }
  0x2f   : > { %v299_v7 = vld [vmem:[%s884_s3] sm:$0xf]  ;;  %s357_s6 = scalar_lea.hbm %s886_s5, %s463_s7  ;;  %s345_s17 = scalar_lea.sflag [#allocation5], %s816_s16 }
  0x30   : > { %292 = vmatpush.msra.mxu0 %v264_v4  ;;  %s360_s8 = sshll.u32 %s357_s6, 4  ;;  %s606_s15 = scalar_lea.hbm %s886_s5, 128  ;;  %s361_s8 = int_to_ptr.hbm [resolvable:$true] %s360_s8 }
  0x31   : > { %s600_s22 = sshra.s32 %s361_s8, 4  ;;  %s601_s22 = int_to_ptr.hbm [resolvable:$true] %s600_s22 }
  0x32   : > { %293 = vmatpush.msra.mxu0 %v263_v5  ;;  %v315_v20 = vstv %s314_s19  ;;  %s602_s29 = scalar_lea.hbm %s601_s22, 32  ;;  %p607_p7 = scmp.lt.s32.totalorder %s601_s22, %s886_s5 }
  0x33   : > { %459 = vmatmul.msk.f32.vlgmr.msra.gmra.mxu0 %vm274_vm0, %v267_v6  ;;  %p603_p3 = scmp.ne.s32.totalorder %s601_s22, %s602_s29  ;;  %p608_p8 = scmp.lt.s32.totalorder %s606_s15, %s602_s29 }
  0x35   : > { %302 = vperm.xlu0 %551, %v299_v7   ;;  %p604_p5 = pnand %p603_p3, %p791_p9  ;;  %p609_p10 = por %p608_p8, %p607_p7 }
  0x37   : > { %p605_p6 = pneg %p604_p5 }
  0x39   : > { %p610_p11 = pnand %p609_p10, %p605_p6 }
  0x9f   : > { %v272_v8 = vpop.permute.xlu0 %271 }
  0xa7   : > { %v303_v12 = vpop.permute.xlu0 %302 }
  0xb0   : > { %v295_v9 = vpop.f32.mrf.mxu0 }
  0xb1   : > { %v296_v10 = vadd.f32 %v295_v9, %v272_v8 }
  0xb3   : > { %v298_v11 = vmax.f32 %v296_v10, 0.0 }
  0xb5   : > { %v305_v13 = vmul.f32 %v303_v12, %v298_v11 }
  0xb7   : > { %v307_v14 = vsel %vm306_vm1, %v305_v13, 0.0 }
  0xb8   : > { %v308_v15 = vrot.slane %v307_v14, 4 }
  0xba   : > { %v309_v16 = vadd.f32 %v308_v15, %v307_v14 }
  0xbc   : > { %v310_v17 = vrot.slane %v309_v16, 2 }
  0xbe   : > { %v311_v18 = vadd.f32 %v310_v17, %v309_v16 }
  0xc0   : > { %v312_v19 = vrot.slane %v311_v18, 1 }
  0xc2   : > { %v313_v21 = vadd.f32 %v312_v19, %v311_v18 }
  0xc4   : > { %v316_v22 = vadd.f32 %v315_v20, %v313_v21 }
  0xc6   : > { %v460_v23 = vmul.f32 -1.442695, %v316_v22 }
  0xc8   : > { %552 = vpow2.f32 %v460_v23 }
  0xce   : > { %v553_v24 = vpop.eup %552 }
  0xcf   : > { %v320_v25 = vadd.f32 1.0, %v553_v24 }
  0xd1   : > { %554 = vrcp.f32 %v320_v25  ;;  %v332_v29 = vand.u32 2147483648, %v320_v25  ;;  %v330_v31 = vand.u32 2147483647, %v320_v25  ;;  %vm326_vm3 = vweird.f32 %v320_v25 }
  0xd3   : > { %v333_v33 = vor.u32 1.1754944e-38, %v332_v29  ;;  %vm331_vm5 = vcmp.eq.f32.partialorder %v330_v31, 8.507059e+37 }
  0xd7   : > { %v555_v26 = vpop.eup %554 }
  0xd8   : > { %v322_v27 = vmul.f32 %v555_v26, %v320_v25  ;;  %vm327_vm2 = vweird.f32 %v555_v26 }
  0xd9   : > { %vm328_vm4 = vmor %vm326_vm3, %vm327_vm2 }
  0xda   : > { %v323_v28 = vsub.f32 1.0, %v322_v27 }
  0xdc   : > { %v324_v30 = vmul.f32 %v555_v26, %v323_v28 }
  0xde   : > { %v325_v32 = vadd.f32 %v555_v26, %v324_v30 }
  0xe0   : > { %v329_v34 = vsel %vm328_vm4, %v555_v26, %v325_v32 }
  0xe1   : > { %v334_v35 = vsel %vm331_vm5, %v333_v33, %v329_v34 }
  0xe2   : > { %v336_v36 = vmul.f32 %v334_v35, %v263_v5  ;;  %v337_v37 = vmul.f32 %v334_v35, %v264_v4  ;;  %v338_v38 = vmul.f32 %v334_v35, %v265_v2  ;;  %v339_v39 = vmul.f32 %v334_v35, %v266_v1 }
  0xe4   : > { %340 = vst [vmem:[%s262_s24] sm:$0xff] %v336_v36 }
  0xe5   : > { %341 = vst [vmem:[%s262_s24 + $0x8] sm:$0xff] %v337_v37 }
  0xe6   : > { %342 = vst [vmem:[%s262_s24 + $0x10] sm:$0xff] %v338_v38 }
  0xe7   : > { %343 = vst [vmem:[%s262_s24 + $0x18] sm:$0xff] %v339_v39 }
  0xe8   : > { %613 = shalt.err (!%p610_p11)
}
  0xe9   : > { %s690_s16 = smov 128   ;;  %s691_s19 = smov 256  }
  0xea   : > { %s692_s4 = smov 8  }
  0xeb   : > { %468 = dma.vmem_to_hbm [thread:$0]  (%p791_p9), %s359_s23, 512, %s361_s8, %s345_s17, %s690_s16, %s691_s19, %s692_s4  }
  0xec PF: > { %p479_p13 = scmp.ge.s32.totalorder %s684_s27, 2  ;;  %s375_s28 = sand.u32 1, %s656_s20  }
  0xed   : > { %s376_s7 = scalar_lea.sflag [#allocation5], %s375_s28 }
  0xee   : > { %p475_p0 = pnand %p479_p13, %p797_p12 }
  0xf0   : > { %p476_p1 = pneg %p475_p0 }
  0xf2   : > { %651 = dma.done.wait (%p476_p1), %s376_s7, 512  }
  0xf3   : > { %653 = vsyncadd (%p476_p1), %s376_s7, 4294966784  ;;  %s22_s27 = sadd.s32 1, %s684_s27   ;;  %s898_s11 = sld [smem:[#allocation9_spill]] }
  0xf4   : > { %p19_p2 = scmp.ge.s32.totalorder %s22_s27, 6   ;;  %s899_s22 = sld [smem:[#allocation12_spill]] }
  0xf5   : > { %s900_s10 = sld [smem:[#allocation10_spill]]  ;;  %s902_s20 = smov %s660_s21 }
  0xf6   : > { %s901_s12 = sld [smem:[#allocation11_spill]]  ;;  %s904_s23 = smov %s676_s25 }
  0xf7   : > { %s905_s24 = smov %s680_s26 }
  0xf8   :  { %21 = sbr.rel (!%p19_p2) target bundleno = 9 (0x9), region = 85 }
  0xf9   : > { %s903_s21 = smov %s898_s11 }
  0xfb   : > { %s906_s25 = smov %s900_s10 }
  0xfc   : > { %s907_s26 = smov %s901_s12 }
  0xfd   :  { %382 = vsyncpa [#allocation4], 1 }
  0xfe   :  { %384 = vsyncpa [#allocation4 + $0x1], 1 }
  0xff   :  { %385 = vsyncpa [#allocation5], 1 }
 0x100   :  { %387 = vsyncpa [#allocation5 + $0x1], 1 }

</bundles_post_ra>
